<compile_context>
chip_gen: v7x
topology: tpu7x:2x2x1
jax: 0.10.0
libtpu: 0.0.40
codegen_flags: <defaults>
</compile_context>

<pallas_src>
import jax
import jax.numpy as jnp
from jax.experimental import pallas as pl
from jax.experimental.pallas import tpu as pltpu


def _rnn_seq_kernel(x_ref, h0_ref, w_i2h_ref, b_i2h_ref, w_h2o_ref, b_h2o_ref,
                    out_ref, hfin_ref, h_ref):
    """One grid step == one timestep of the recurrence.

    x_ref    : (1, B, n_in)                current timestep's input block
    h0_ref   : (B, n_hidden)               initial hidden state (resident)
    w_i2h_ref: (n_in+n_hidden, n_hidden)   resident across the whole grid
    b_i2h_ref: (1, n_hidden)               resident
    w_h2o_ref: (n_hidden, n_out)           resident
    b_h2o_ref: (1, n_out)                  resident
    out_ref  : (1, B, n_out)               this timestep's log-softmax block
    hfin_ref : (B, n_hidden)               final hidden state (written last step)
    h_ref    : (B, n_hidden) VMEM scratch  recurrent carry (never leaves VMEM)
    """
    t = pl.program_id(0)

    @pl.when(t == 0)
    def _seed():
        h_ref[...] = h0_ref[...]

    x = x_ref[0]                  # (B, n_in)
    h = h_ref[...]                # (B, n_hidden)

    # combined = cat([x, h], 1); single fused i2h matmul on the MXU.
    xh = jnp.concatenate([x, h], axis=-1)
    pre = jnp.dot(xh, w_i2h_ref[...],
                  preferred_element_type=jnp.float32) + b_i2h_ref[...]
    h_new = jax.nn.sigmoid(pre)
    h_ref[...] = h_new            # carry to the next timestep (stays in VMEM)

    # Output head; dropout == identity in eval mode.
    logits = jnp.dot(h_new, w_h2o_ref[...],
                     preferred_element_type=jnp.float32) + b_h2o_ref[...]
    m = jnp.max(logits, axis=-1, keepdims=True)
    lse = m + jnp.log(jnp.sum(jnp.exp(logits - m), axis=-1, keepdims=True))
    out_ref[0] = (logits - lse).astype(out_ref.dtype)

    @pl.when(t == pl.num_programs(0) - 1)
    def _final():
        hfin_ref[...] = h_new.astype(hfin_ref.dtype)


def rnn_forward_sequence(xs, h0, params):
    """xs: (T, B, n_in), h0: (B, n_hidden).

    Returns (out, h_final): out is (T, B, n_out) per-step log-softmax, h_final
    is the hidden state after the last step. Each step matches RNN.forward.
    """
    T, B, n_in = xs.shape
    n_hidden = h0.shape[1]
    n_comb = params["W_i2h"].shape[0]
    n_out = params["b_h2o"].shape[1]
    assert n_comb == n_in + n_hidden

    flops = T * (2 * B * n_comb * n_hidden + 2 * B * n_hidden * n_out)
    transcendentals = T * B * (n_hidden + n_out + 1)
    bytes_accessed = 4 * (xs.size + h0.size + T * B * n_out + B * n_hidden
                          + sum(int(p.size) for p in params.values()))

    grid_spec = pltpu.PrefetchScalarGridSpec(
        num_scalar_prefetch=0,
        grid=(T,),
        in_specs=[
            pl.BlockSpec((1, B, n_in), lambda t: (t, 0, 0)),    # x_t streamed per step
            pl.BlockSpec((B, n_hidden), lambda t: (0, 0)),      # h0 (resident)
            pl.BlockSpec((n_comb, n_hidden), lambda t: (0, 0)),  # W_i2h (resident)
            pl.BlockSpec((1, n_hidden), lambda t: (0, 0)),      # b_i2h (resident)
            pl.BlockSpec((n_hidden, n_out), lambda t: (0, 0)),  # W_h2o (resident)
            pl.BlockSpec((1, n_out), lambda t: (0, 0)),         # b_h2o (resident)
        ],
        out_specs=(
            pl.BlockSpec((1, B, n_out), lambda t: (t, 0, 0)),   # out_t per step
            pl.BlockSpec((B, n_hidden), lambda t: (0, 0)),      # final hidden
        ),
        scratch_shapes=[pltpu.VMEM((B, n_hidden), jnp.float32)],
    )

    fn = pl.pallas_call(
        _rnn_seq_kernel,
        out_shape=(
            jax.ShapeDtypeStruct((T, B, n_out), jnp.float32),
            jax.ShapeDtypeStruct((B, n_hidden), jnp.float32),
        ),
        grid_spec=grid_spec,
        compiler_params=pltpu.CompilerParams(
            dimension_semantics=("arbitrary",),  # recurrent carry => sequential
        ),
        cost_estimate=pl.CostEstimate(
            flops=flops,
            transcendentals=transcendentals,
            bytes_accessed=bytes_accessed,
        ),
    )
    return fn(xs, h0, params["W_i2h"], params["b_i2h"],
              params["W_h2o"], params["b_h2o"])


def rnn_step(x, h, params):
    """Exactly RNN.forward(input, hidden): one timestep (T == 1)."""
    out_seq, h_new = rnn_forward_sequence(x[None], h, params)
    return out_seq[0], h_new


def init_params(key, n_in, n_hidden, n_out):
    """PyTorch nn.Linear-style init: uniform(-1/sqrt(fan_in), 1/sqrt(fan_in)).

    Weights are stored pre-transposed as (in_features, out_features); W_i2h is
    a single (n_in+n_hidden, n_hidden) matrix (no x/h split) so the kernel can
    run one fused i2h matmul per step.
    """
    ks = jax.random.split(key, 4)

    def u(k, fan_in, shape):
        bound = 1.0 / jnp.sqrt(jnp.float32(fan_in))
        return jax.random.uniform(k, shape, jnp.float32, -bound, bound)

    return {
        "W_i2h": u(ks[0], n_in + n_hidden, (n_in + n_hidden, n_hidden)),
        "b_i2h": u(ks[1], n_in + n_hidden, (1, n_hidden)),
        "W_h2o": u(ks[2], n_hidden, (n_hidden, n_out)),
        "b_h2o": u(ks[3], n_hidden, (1, n_out)),
    }


def rnn_reference(xs, h0, params):
    """Plain-JAX reference: the PyTorch forward applied step-by-step (eval mode)."""
    def step(h, x):
        combined = jnp.concatenate([x, h], axis=1)
        h_new = jax.nn.sigmoid(combined @ params["W_i2h"] + params["b_i2h"])
        logits = h_new @ params["W_h2o"] + params["b_h2o"]
        return h_new, jax.nn.log_softmax(logits, axis=1)

    h_fin, outs = jax.lax.scan(step, h0, xs)
    return outs, h_fin


if __name__ == "__main__":
    n_in, n_hidden, n_out = 16, 32, 16
    batch, seq = 8, 8

    key = jax.random.PRNGKey(0)
    k_p, k_x, k_h = jax.random.split(key, 3)
    params = init_params(k_p, n_in, n_hidden, n_out)

    xs = jax.random.normal(k_x, (seq, batch, n_in), jnp.float32)
    # init_hidden() would give zeros; random h0 exercises the recurrent term.
    h0 = jax.random.normal(k_h, (batch, n_hidden), jnp.float32)

    out, h_fin = jax.block_until_ready(rnn_forward_sequence(xs, h0, params))

    out_ref, h_fin_ref = rnn_reference(xs, h0, params)
    # Tolerance is loose-ish because MXU f32 matmuls inside the kernel may use a
    # different bf16-pass decomposition than XLA's default outside it.
    tol = dict(atol=5e-3, rtol=5e-3)
    assert out.shape == (seq, batch, n_out) and h_fin.shape == (batch, n_hidden)
    assert jnp.allclose(out, out_ref, **tol), float(jnp.max(jnp.abs(out - out_ref)))
    assert jnp.allclose(h_fin, h_fin_ref, **tol), float(jnp.max(jnp.abs(h_fin - h_fin_ref)))

    # Single step == the original module's forward(input, hidden).
    out1, h1 = jax.block_until_ready(rnn_step(xs[0], h0, params))
    h1_ref = jax.nn.sigmoid(
        jnp.concatenate([xs[0], h0], axis=1) @ params["W_i2h"] + params["b_i2h"])
    out1_ref = jax.nn.log_softmax(h1_ref @ params["W_h2o"] + params["b_h2o"], axis=1)
    assert jnp.allclose(out1, out1_ref, **tol)
    assert jnp.allclose(h1, h1_ref, **tol)

    # TODO(synk): nn.Dropout is active only in training; eval-mode identity is
    # what is implemented here.
    # TODO(synk): layer_norm=True branch (LayerNorm + ReLU) not implemented; the
    # module default (layer_norm=False, Sigmoid activation) is covered.
    # TODO(synk): for non-toy sizes, cast matmul operands to bf16 (v6e/v7x) and
    # add a leading parallel batch grid axis so v7x's two TensorCores both work.

    print("KERNEL_OK")
</pallas_src>

<mosaic_0001>
module attributes {stable_mosaic.version = 11 : i64} {
  func.func @_rnn_seq_kernel(%arg0: i32, %arg1: memref<1x8x16xf32, #tpu.memory_space<vmem>>, %arg2: memref<8x32xf32, #tpu.memory_space<vmem>>, %arg3: memref<48x32xf32, #tpu.memory_space<vmem>>, %arg4: memref<1x32xf32, #tpu.memory_space<vmem>>, %arg5: memref<32x16xf32, #tpu.memory_space<vmem>>, %arg6: memref<1x16xf32, #tpu.memory_space<vmem>>, %arg7: memref<1x8x16xf32, #tpu.memory_space<vmem>>, %arg8: memref<8x32xf32, #tpu.memory_space<vmem>>, %arg9: memref<8x32xf32, #tpu.memory_space<vmem>>) attributes {dimension_semantics = [#tpu.dimension_semantics<arbitrary>], iteration_bounds = array<i64: 8>, scalar_prefetch = 0 : i64, scratch_operands = 1 : i64, tpu.core_type = #tpu.core_type<tc>, window_params = [{transform_indices = @transform_0, window_bounds = array<i64: 1, 8, 16>}, {pipeline_mode = #tpu.pipeline_mode<synchronous>, transform_indices = @transform_1, window_bounds = array<i64: 8, 32>}, {pipeline_mode = #tpu.pipeline_mode<synchronous>, transform_indices = @transform_2, window_bounds = array<i64: 48, 32>}, {pipeline_mode = #tpu.pipeline_mode<synchronous>, transform_indices = @transform_3, window_bounds = array<i64: 1, 32>}, {pipeline_mode = #tpu.pipeline_mode<synchronous>, transform_indices = @transform_4, window_bounds = array<i64: 32, 16>}, {pipeline_mode = #tpu.pipeline_mode<synchronous>, transform_indices = @transform_5, window_bounds = array<i64: 1, 16>}, {transform_indices = @transform_6, window_bounds = array<i64: 1, 8, 16>}, {pipeline_mode = #tpu.pipeline_mode<synchronous>, transform_indices = @transform_7, window_bounds = array<i64: 8, 32>}]} {
    %c0_i32 = arith.constant 0 : i32
    %0 = arith.cmpi eq, %arg0, %c0_i32 : i32
    %1 = arith.extui %0 : i1 to i32
    %c0_i32_0 = arith.constant 0 : i32
    %2 = arith.cmpi ne, %1, %c0_i32_0 : i32
    scf.if %2 {
      %c0_23 = arith.constant 0 : index
      %c0_24 = arith.constant 0 : index
      %40 = vector.load %arg2[%c0_23, %c0_24] : memref<8x32xf32, #tpu.memory_space<vmem>>, vector<8x32xf32>
      %c0_25 = arith.constant 0 : index
      %c0_26 = arith.constant 0 : index
      %41 = vector.load %arg9[%c0_25, %c0_26] : memref<8x32xf32, #tpu.memory_space<vmem>>, vector<8x32xf32>
      tpu.vector_store %arg9[%c0_25, %c0_26], %40 {strides = array<i32>} : memref<8x32xf32, #tpu.memory_space<vmem>>, vector<8x32xf32>,
    } else {
    }
    %c0 = arith.constant 0 : index
    %c0_1 = arith.constant 0 : index
    %c0_2 = arith.constant 0 : index
    %3 = vector.load %arg1[%c0, %c0_1, %c0_2] : memref<1x8x16xf32, #tpu.memory_space<vmem>>, vector<1x8x16xf32>
    %4 = vector.shape_cast %3 : vector<1x8x16xf32> to vector<8x16xf32>
    %c0_3 = arith.constant 0 : index
    %c0_4 = arith.constant 0 : index
    %5 = vector.load %arg9[%c0_3, %c0_4] : memref<8x32xf32, #tpu.memory_space<vmem>>, vector<8x32xf32>
    %6 = tpu.concatenate %4, %5 in 1 : vector<8x16xf32>, vector<8x32xf32> -> vector<8x48xf32>
    %c0_5 = arith.constant 0 : index
    %c0_6 = arith.constant 0 : index
    %7 = vector.load %arg3[%c0_5, %c0_6] : memref<48x32xf32, #tpu.memory_space<vmem>>, vector<48x32xf32>
    %cst = arith.constant dense<0.000000e+00> : vector<8x32xf32>
    %8 = tpu.matmul %6, %7, %cst {dimension_numbers = #tpu.dot_dimension_numbers<[1], [0], [0], [1], [0, 0, 1, 1], [], []>} : vector<8x48xf32>, vector<48x32xf32>, vector<8x32xf32> -> vector<8x32xf32>
    %c0_7 = arith.constant 0 : index
    %c0_8 = arith.constant 0 : index
    %9 = vector.load %arg4[%c0_7, %c0_8] : memref<1x32xf32, #tpu.memory_space<vmem>>, vector<1x32xf32>
    %10 = vector.broadcast %9 : vector<1x32xf32> to vector<8x32xf32>
    %11 = arith.addf %8, %10 : vector<8x32xf32>
    %12 = arith.negf %11 : vector<8x32xf32>
    %13 = math.exp %12 : vector<8x32xf32>
    %cst_9 = arith.constant 1.000000e+00 : f32
    %14 = vector.broadcast %cst_9 : f32 to vector<8x32xf32>
    %15 = arith.addf %14, %13 : vector<8x32xf32>
    %16 = arith.divf %14, %15 : vector<8x32xf32>
    %c0_10 = arith.constant 0 : index
    %c0_11 = arith.constant 0 : index
    %17 = vector.load %arg9[%c0_10, %c0_11] : memref<8x32xf32, #tpu.memory_space<vmem>>, vector<8x32xf32>
    tpu.vector_store %arg9[%c0_10, %c0_11], %16 {strides = array<i32>} : memref<8x32xf32, #tpu.memory_space<vmem>>, vector<8x32xf32>,
    %c0_12 = arith.constant 0 : index
    %c0_13 = arith.constant 0 : index
    %18 = vector.load %arg5[%c0_12, %c0_13] : memref<32x16xf32, #tpu.memory_space<vmem>>, vector<32x16xf32>
    %cst_14 = arith.constant dense<0.000000e+00> : vector<8x16xf32>
    %19 = tpu.matmul %16, %18, %cst_14 {dimension_numbers = #tpu.dot_dimension_numbers<[1], [0], [0], [1], [0, 0, 1, 1], [], []>} : vector<8x32xf32>, vector<32x16xf32>, vector<8x16xf32> -> vector<8x16xf32>
    %c0_15 = arith.constant 0 : index
    %c0_16 = arith.constant 0 : index
    %20 = vector.load %arg6[%c0_15, %c0_16] : memref<1x16xf32, #tpu.memory_space<vmem>>, vector<1x16xf32>
    %21 = vector.broadcast %20 : vector<1x16xf32> to vector<8x16xf32>
    %22 = arith.addf %19, %21 : vector<8x16xf32>
    %cst_17 = arith.constant dense<0xFF800000> : vector<8xf32>
    %23 = vector.multi_reduction <maximumf>, %22, %cst_17 [1] : vector<8x16xf32> to vector<8xf32>
    %24 = vector.shape_cast %23 : vector<8xf32> to vector<8x1xf32>
    %25 = vector.broadcast %24 : vector<8x1xf32> to vector<8x16xf32>
    %26 = arith.subf %22, %25 : vector<8x16xf32>
    %27 = math.exp %26 : vector<8x16xf32>
    %cst_18 = arith.constant dense<0.000000e+00> : vector<8xf32>
    %28 = vector.multi_reduction <add>, %27, %cst_18 [1] : vector<8x16xf32> to vector<8xf32>
    %29 = vector.shape_cast %28 : vector<8xf32> to vector<8x1xf32>
    %30 = math.log %29 : vector<8x1xf32>
    %31 = arith.addf %24, %30 : vector<8x1xf32>
    %32 = vector.broadcast %31 : vector<8x1xf32> to vector<8x16xf32>
    %33 = arith.subf %22, %32 : vector<8x16xf32>
    %c0_19 = arith.constant 0 : index
    %c0_20 = arith.constant 0 : index
    %c0_21 = arith.constant 0 : index
    %34 = vector.load %arg7[%c0_19, %c0_20, %c0_21] : memref<1x8x16xf32, #tpu.memory_space<vmem>>, vector<1x8x16xf32>
    %35 = vector.shape_cast %34 : vector<1x8x16xf32> to vector<8x16xf32>
    %36 = vector.shape_cast %33 : vector<8x16xf32> to vector<1x8x16xf32>
    tpu.vector_store %arg7[%c0_19, %c0_20, %c0_21], %36 {strides = array<i32>} : memref<1x8x16xf32, #tpu.memory_space<vmem>>, vector<1x8x16xf32>,
    %c7_i32 = arith.constant 7 : i32
    %37 = arith.cmpi eq, %arg0, %c7_i32 : i32
    %38 = arith.extui %37 : i1 to i32
    %c0_i32_22 = arith.constant 0 : i32
    %39 = arith.cmpi ne, %38, %c0_i32_22 : i32
    scf.if %39 {
      %c0_23 = arith.constant 0 : index
      %c0_24 = arith.constant 0 : index
      %40 = vector.load %arg8[%c0_23, %c0_24] : memref<8x32xf32, #tpu.memory_space<vmem>>, vector<8x32xf32>
      tpu.vector_store %arg8[%c0_23, %c0_24], %16 {strides = array<i32>} : memref<8x32xf32, #tpu.memory_space<vmem>>, vector<8x32xf32>,
    } else {
    }
    return
  }
  func.func @transform_0(%arg0: i32) -> (i32, i32, i32) {
    %c0_i32 = arith.constant 0 : i32
    %c0_i32_0 = arith.constant 0 : i32
    %c0_i32_1 = arith.constant 0 : i32
    return %arg0, %c0_i32, %c0_i32_0 : i32, i32, i32
  }
  func.func @transform_1(%arg0: i32) -> (i32, i32) {
    %c0_i32 = arith.constant 0 : i32
    %c0_i32_0 = arith.constant 0 : i32
    %c0_i32_1 = arith.constant 0 : i32
    return %c0_i32, %c0_i32_0 : i32, i32
  }
  func.func @transform_2(%arg0: i32) -> (i32, i32) {
    %c0_i32 = arith.constant 0 : i32
    %c0_i32_0 = arith.constant 0 : i32
    %c0_i32_1 = arith.constant 0 : i32
    return %c0_i32, %c0_i32_0 : i32, i32
  }
  func.func @transform_3(%arg0: i32) -> (i32, i32) {
    %c0_i32 = arith.constant 0 : i32
    %c0_i32_0 = arith.constant 0 : i32
    %c0_i32_1 = arith.constant 0 : i32
    return %c0_i32, %c0_i32_0 : i32, i32
  }
  func.func @transform_4(%arg0: i32) -> (i32, i32) {
    %c0_i32 = arith.constant 0 : i32
    %c0_i32_0 = arith.constant 0 : i32
    %c0_i32_1 = arith.constant 0 : i32
    return %c0_i32, %c0_i32_0 : i32, i32
  }
  func.func @transform_5(%arg0: i32) -> (i32, i32) {
    %c0_i32 = arith.constant 0 : i32
    %c0_i32_0 = arith.constant 0 : i32
    %c0_i32_1 = arith.constant 0 : i32
    return %c0_i32, %c0_i32_0 : i32, i32
  }
  func.func @transform_6(%arg0: i32) -> (i32, i32, i32) {
    %c0_i32 = arith.constant 0 : i32
    %c0_i32_0 = arith.constant 0 : i32
    %c0_i32_1 = arith.constant 0 : i32
    return %arg0, %c0_i32, %c0_i32_0 : i32, i32, i32
  }
  func.func @transform_7(%arg0: i32) -> (i32, i32) {
    %c0_i32 = arith.constant 0 : i32
    %c0_i32_0 = arith.constant 0 : i32
    %c0_i32_1 = arith.constant 0 : i32
    return %c0_i32, %c0_i32_0 : i32, i32
  }
}

</mosaic_0001>

<bundles_post_ra>
// kernel: tpu_custom_call.1
= control target key start
LH: loop header
LB: loop body
LE: loop exit
PB: predicated region body
PF: predicated region fallthrough
CT: control target
= control target key end

     0   :  { %13 = vsyncpa [#allocation4], 0  ;;  %s1031_s0 = inlined_call_operand.vmem [shape: f32[8,8,16], index: 0, kind: input, shape index: {}]   ;;  %s1032_s1 = inlined_call_operand.vmem [shape: f32[8,32], index: 1, kind: input, shape index: {}]   ;;  %s1033_s2 = inlined_call_operand.vmem [shape: f32[48,32], index: 2, kind: input, shape index: {}]   ;;  %s1034_s3 = inlined_call_operand.vmem [shape: f32[1,32], index: 3, kind: input, shape index: {}]   ;;  %s1035_s4 = inlined_call_operand.vmem [shape: f32[32,16], index: 4, kind: input, shape index: {}]   ;;  %s1036_s5 = inlined_call_operand.vmem [shape: f32[1,16], index: 5, kind: input, shape index: {}]   ;;  %s1037_s6 = inlined_call_operand.hbm [shape: f32[8,8,16], index: 6, kind: output, shape index: {0}]   ;;  %s1038_s7 = inlined_call_operand.hbm [shape: f32[8,32], index: 7, kind: output, shape index: {1}]  }
   0x1   :  { %15 = vsyncpa [#allocation4 + $0x1], 0 }
   0x2   :  { %16 = vsyncpa [#allocation6], 0  ;;  %s851_s24 = smov 0   ;;  %s853_s25 = smov 0  }
   0x3   :  { %s855_s26 = smov 0   ;;  %s857_s27 = smov 0  }
   0x4 LB: > { %s872_s28 = sadd.s32 4294967295, %s803_s27   ;;  %s581_s29 = sadd.s32 4294967294, %s803_s27   ;;  %s803_s27 = sphi %s857_s27, %s1045_s27   ;;  %s799_s26 = sphi %s855_s26, %s1044_s26   ;;  %s795_s25 = sphi %s853_s25, %s1043_s25   ;;  %s791_s24 = sphi %s851_s24, %s1042_s24  }
   0x5   : > { %s876_s30 = sadd.s32 1, %s803_s27   ;;  %s160_s8 = sadd.s32 1, %s799_s26 }
   0x6   : > { %s157_s9 = ssub.s32 %s803_s27, %s876_s30  ;;  %p170_p0 = scmp.ne.s32.totalorder %s799_s26, %s795_s25 }
   0x7   : > { %p158_p1 = scmp.eq.s32.totalorder %s157_s9, 0  ;;  %p171_p2 = scmp.eq.s32.totalorder %s872_s28, 7 }
   0x8   : > { %p176_p3 = scmp.ne.s32.totalorder %s795_s25, %s791_s24  ;;  %p177_p4 = scmp.eq.s32.totalorder %s581_s29, 7 }
   0x9   : > { %s887_s10 = scalar_select %p158_p1, %s799_s26, %s160_s8  }
   0xa   : > { %p891_p5 = por %p171_p2, %p170_p0  ;;  %p895_p6 = por %p177_p4, %p176_p3 }
   0xb   : > { %p584_p7 = scmp.ge.s32.totalorder %s803_s27, 1  ;;  %p238_p8 = scmp.lt.s32.totalorder %s803_s27, 9 }
   0xc   : > { %s1040_s12 = scalar_select %p895_p6, 1, 0 }
   0xd   : > { %p239_p9 = pnand %p584_p7, %p238_p8 }
   0xe   : > { %s264_s13 = sand.u32 (!%p239_p9), 1, %s795_s25   ;;  %p269_p10 = scmp.lt.s32.totalorder (!%p239_p9), %s872_s28, 7 }
   0xf   : > { %242 = sbr.rel (%p239_p9) target bundleno = 970 (0x3ca), region = 44  ;;  %s905_s14 = sshll.u32 (!%p239_p9), %s264_s13, 3 }
  0x10   : > { %s266_s20 = scalar_lea.vmem (!%p239_p9), [#allocation3], %s905_s14  ;;  %p587_p11 = scmp.ne.s32.totalorder (!%p239_p9), %s872_s28, 0 }
  0x16   : > { %s270_s15 = scalar_select %p269_p10, %s872_s28, 7 }
  0x17   : > { %276 = sbr.rel (%p587_p11) target bundleno = 30 (0x1e), region = 48  ;;  %v277_v0 = vld [vmem:[%s1032_s1] sm:$0xff] (!%p587_p11)  ;;  %vm278_vm0 = vcmask (!%p587_p11), 261120  }
  0x18   : > { %s586_s16 = sshll.u32 %s270_s15, 3  ;;  %279 = vst.msk [vmem:[#allocation2] sm:$0xff] (!%p587_p11), %vm278_vm0, %v277_v0 }
  0x19   : > { %s911_s19 = scalar_lea.vmem %s1031_s0, %s586_s16 }
  0x1e PF: > { %v288_v2 = vld [vmem:[%s1033_s2] sm:$0xff]  ;;  %v289_v3 = vld [vmem:[%s1033_s2 + $0x8] sm:$0xff]  ;;  %s805_s15 = smov 16   ;;  %v806_v4 = vmov 0.0|0.0   ;;  %v290_v6 = vld [vmem:[%s1033_s2 + $0x10] sm:$0xff]  ;;  %vm807_vm1 = vmmov 0  }
  0x1f   : > { %v281_v1 = vld [vmem:[#allocation2] sm:$0xff]  ;;  %638 = vmatprep.subr.bf16.mxu0 %v806_v4  ;;  %v639_v5 = vpack.c.bf16 %v289_v3, %v288_v2  ;;  %v291_v7 = vld [vmem:[%s1033_s2 + $0x18] sm:$0xff]  ;;  %v808_v8 = vmov 0.0   ;;  %647 = vmatprep.subr.bf16.mxu1 %v806_v4  ;;  %v293_v11 = vld [vmem:[%s1033_s2 + $0x28] sm:$0xff]  ;;  %vm286_vm2 = vcmask 130048   ;;  %vm301_vm3 = vcmask 392192  }
  0x20   : > { %283 = vrot.lane.b32.xlu0 %v281_v1, %s805_s15  ;;  %624 = vmatprep.mubr.msk.f32.mxu0 %vm807_vm1, %v808_v8  ;;  %v642_v9 = vpack.c.bf16 %v291_v7, %v290_v6  ;;  %v292_v10 = vld [vmem:[%s1033_s2 + $0x20] sm:$0xff]  ;;  %v384_v17 = vld [vmem:[%s1035_s4 + $0x8] sm:$0xff]  ;;  %v385_v18 = vld [vmem:[%s1035_s4 + $0x10] sm:$0xff]  ;;  %vm381_vm4 = vcmask 261120   ;;  %p593_p12 = scmp.ne.s32.totalorder %s872_s28, 7 }
  0x21   : > { %640 = vmatpush3.bf16.msra.mxu0 %v639_v5  ;;  %635 = vmatprep.mubr.msk.f32.mxu1 %vm807_vm1, %v808_v8  ;;  %v645_v12 = vpack.c.bf16 %v293_v11, %v292_v10  ;;  %v280_v13 = vld [vmem:[%s911_s19] sm:$0xff]  ;;  %v386_v20 = vld [vmem:[%s1035_s4 + $0x18] sm:$0xff] }
  0x22   : > { %641 = vmatprep.subr.bf16.mxu0 %v806_v4  ;;  %v383_v16 = vld [vmem:[%s1035_s4] sm:$0xff]  ;;  %v651_v21 = vpack.c.bf16 %v386_v20, %v385_v18 }
  0x23   : > { %v648_v19 = vpack.c.bf16 %v384_v17, %v383_v16  ;;  %v588_v22 = vld [vmem:[%s1034_s3] ss:$0 sm:$0xff] }
  0x24   : > { %v591_v30 = vld [vmem:[%s1036_s5] ss:$0 sm:$0xff] }
  0x25   : > { %643 = vmatpush3.bf16.msra.mxu0 %v642_v9  ;;  %649 = vmatpush3.bf16.msra.mxu1 %v648_v19 }
  0x26   : > { %644 = vmatprep.subr.bf16.mxu0 %v806_v4  ;;  %650 = vmatprep.subr.bf16.mxu1 %v806_v4 }
  0x29   : > { %646 = vmatpush3.bf16.msra.mxu0 %v645_v12  ;;  %652 = vmatpush3.bf16.msra.mxu1 %v651_v21 }
  0x92   : > { %v284_v14 = vpop.permute.xlu0 %283 }
  0x93   : > { %v287_v15 = vsel %vm286_vm2, %v280_v13, %v284_v14 }
  0x94   : > { %625 = vmatmul.mubr.msk.f32.vlgmr.msra.gmra.mrb[0].mxu0 %vm301_vm3, %v287_v15 }
 0x167   : > { %v371_v23 = vpop.f32.mrb[0].mxu0 }
 0x168   : > { %v372_v24 = vadd.f32 %v588_v22, %v371_v23  ;;  %v626_v25 = vpop.f32.mrb[1].mxu0 }
 0x16a   : > { %v590_v26 = vmul.f32 -1.442695, %v372_v24 }
 0x16c   : > { %703 = vpow2.f32 %v590_v26 }
 0x176   : > { %v704_v27 = vpop.eup %703 }
 0x177   : > { %v378_v28 = vadd.f32 1.0, %v704_v27 }
 0x179   : > { %705 = vrcp.f32 %v378_v28 }
 0x183   : > { %v706_v29 = vpop.eup %705 }
 0x184   : > { %382 = vst.msk [vmem:[#allocation2] sm:$0xff] %vm381_vm4, %v706_v29  ;;  %636 = vmatmul.mubr.msk.f32.vlgmr.msra.gmra.mrb[0].mxu1 %vm381_vm4, %v706_v29  ;;  %485 = vst.msk [vmem:[#allocation5] sm:$0xff] (!%p593_p12), %vm381_vm4, %v706_v29 }
 0x257   : > { %v463_v31 = vpop.f32.mrb[0].mxu1 }
 0x258   : > { %v464_v32 = vadd.f32 %v591_v30, %v463_v31  ;;  %v637_v33 = vpop.f32.mrb[1].mxu1 }
 0x25a   : > { %v467_v34 = vsel %vm286_vm2, %v464_v32, -inf }
 0x25b   : > { %468 = vmax.xlane.f32.xlu0 %v467_v34 }
 0x2e8   : > { %v469_v35 = vpop.xlane.xlu0 %468 }
 0x2e9   : > { %v470_v36 = vsub.f32 %v464_v32, %v469_v35 }
 0x2eb   : > { %v471_v37 = vmul.f32 1.442695, %v470_v36 }
 0x2ed   : > { %707 = vpow2.f32 %v471_v37 }
 0x2f7   : > { %v708_v38 = vpop.eup %707 }
 0x2f8   : > { %v473_v39 = vsel %vm286_vm2, %v708_v38, 0.0 }
 0x2f9   : > { %474 = vadd.xlane.f32.xlu1 %v473_v39 }
 0x386   : > { %v475_v40 = vpop.xlane.xlu1 %474 }
 0x387   : > { %709 = vlog2.f32 %v475_v40 }
 0x391   : > { %v710_v41 = vpop.eup %709 }
 0x392   : > { %v477_v42 = vmul.f32 0.6931472, %v710_v41  ;;  %484 = sbr.rel (%p593_p12) target bundleno = 921 (0x399), region = 52 }
 0x394   : > { %v478_v43 = vadd.f32 %v477_v42, %v469_v35 }
 0x396   : > { %v479_v44 = vsub.f32 %v464_v32, %v478_v43 }
 0x398   : > { %480 = vst.msk [vmem:[%s266_s20] sm:$0xff] %vm286_vm2, %v479_v44 }
 0x399 PF: > { %s595_s15 = sshll.u32 %s872_s28, 7  ;;  %s500_s21 = sshll.u32 %s266_s20, 4  ;;  %s501_s21 = int_to_ptr.vmem [resolvable:$true] %s500_s21 }
 0x39a   : > { %s969_s18 = scalar_lea.hbm %s1037_s6, %s595_s15  ;;  %s487_s22 = scalar_lea.sflag [#allocation4], %s264_s13 }
 0x39b   : > { %s711_s19 = scalar_lea.vmem %s501_s21, 128  ;;  %s809_s23 = smov [#allocation3]  }
 0x39c   : > { %p712_p13 = scmp.ne.s32.totalorder %s501_s21, %s711_s19  ;;  %s715_s29 = sshll.u32 %s809_s23, 4  ;;  %s716_s29 = int_to_ptr.vmem [resolvable:$false] %s715_s29 }
 0x39d   : > { %s717_s8 = scalar_lea.vmem %s716_s29, 256  ;;  %p718_p3 = scmp.lt.s32.totalorder %s501_s21, %s716_s29 }
 0x39e   : > { %p713_p0 = pnand %p712_p13, %p891_p5  ;;  %p719_p4 = scmp.lt.s32.totalorder %s717_s8, %s711_s19 }
 0x3a0   : > { %p714_p1 = pneg %p713_p0  ;;  %p720_p7 = por %p719_p4, %p718_p3 }
 0x3a2   : > { %p721_p8 = pnand %p720_p7, %p714_p1 }
 0x3a4   : > { %724 = shalt.err (!%p721_p8)
}
 0x3a5   : > { %s725_s13 = scalar_lea.hbm %s969_s18, 128  ;;  %s729_s9 = scalar_lea.hbm %s1037_s6, 1024 }
 0x3a6   : > { %p726_p9 = scmp.ne.s32.totalorder %s969_s18, %s725_s13  ;;  %p730_p12 = scmp.lt.u32.totalorder %s969_s18, %s1037_s6 }
 0x3a7   : > { %p731_p13 = scmp.lt.u32.totalorder %s729_s9, %s725_s13  ;;  %p733_p1 = scmp.lt.u32.totalorder %s725_s13, %s969_s18 }
 0x3a8   : > { %p727_p10 = pnand %p726_p9, %p891_p5 }
 0x3a9   : > { %p732_p0 = por %p731_p13, %p730_p12 }
 0x3aa   : > { %p728_p11 = pneg %p727_p10 }
 0x3ab   : > { %p734_p3 = por %p733_p1, %p732_p0 }
 0x3ad   : > { %p735_p4 = pnand %p734_p3, %p728_p11 }
 0x3af   : > { %738 = shalt.err (!%p735_p4)
}
 0x3b0   : > { %653 = dma.vmem_to_hbm [thread:$0]  (%p891_p5), %s501_s21, 128, %s969_s18, %s487_s22  }
 0x3b1   : > { %s810_s17 = smov [#allocation5]  }
 0x3b2   : > { %s511_s19 = sshll.u32 %s810_s17, 4  ;;  %s512_s19 = int_to_ptr.vmem [resolvable:$true] %s511_s19 }
 0x3b3   : > { %s739_s23 = scalar_lea.vmem %s512_s19, 128  ;;  %p746_p10 = scmp.lt.s32.totalorder %s512_s19, %s512_s19 }
 0x3b4   : > { %p740_p7 = scmp.ne.s32.totalorder %s512_s19, %s739_s23  ;;  %p747_p6 = scmp.lt.s32.totalorder %s739_s23, %s739_s23 }
 0x3b6   : > { %p741_p8 = pnand %p740_p7, %p171_p2  ;;  %p748_p12 = por %p747_p6, %p746_p10 }
 0x3b8   : > { %p742_p9 = pneg %p741_p8 }
 0x3ba   : > { %p749_p13 = pnand %p748_p12, %p742_p9 }
 0x3bc   : > { %752 = shalt.err (!%p749_p13)
}
 0x3bd   : > { %s753_s11 = scalar_lea.hbm %s1038_s7, 128 }
 0x3be   : > { %p754_p5 = scmp.ne.s32.totalorder %s1038_s7, %s753_s11  ;;  %p759_p1 = scmp.lt.u32.totalorder %s753_s11, %s1038_s7 }
 0x3c0   : > { %p755_p11 = pnand %p754_p5, %p171_p2 }
 0x3c2   : > { %p756_p0 = pneg %p755_p11 }
 0x3c4   : > { %p761_p3 = pnand %p759_p1, %p756_p0 }
 0x3c6   : > { %764 = shalt.err (!%p761_p3)
}
 0x3c7   : > { %655 = dma.vmem_to_hbm [thread:$0]  (%p171_p2), %s512_s19, 128, %s1038_s7, [#allocation6]  }
 0x3c8   : > { %782 = dma.done.wait (%p171_p2), [#allocation6], 128  }
 0x3c9   : > { %784 = vsyncadd (%p171_p2), [#allocation6], 4294967168 }
 0x3ca PF: > { %p665_p6 = scmp.ge.s32.totalorder %s803_s27, 2  ;;  %s527_s9 = sand.u32 1, %s791_s24  }
 0x3cb   : > { %p1041_p4 = scmp.ne.s32.totalorder %s1040_s12, 0  ;;  %s528_s15 = scalar_lea.sflag [#allocation4], %s527_s9 }
 0x3cd   : > { %p660_p7 = pnand %p665_p6, %p1041_p4 }
 0x3cf   : > { %786 = dma.done.wait (!%p660_p7), %s528_s15, 128  }
 0x3d0   : > { %788 = vsyncadd (!%p660_p7), %s528_s15, 4294967168  ;;  %p19_p8 = scmp.ge.s32.totalorder %s876_s30, 10   ;;  %s1042_s24 = smov %s795_s25 }
 0x3d1   : > { %s1043_s25 = smov %s799_s26  ;;  %s1044_s26 = smov %s887_s10 }
 0x3d2   : > { %s1045_s27 = smov %s876_s30  ;;  %21 = sbr.rel (!%p19_p8) target bundleno = 4 (0x4), region = 95 }
 0x3d9   :  { %533 = vsyncpa [#allocation4], 1 }
 0x3da   :  { %535 = vsyncpa [#allocation4 + $0x1], 1 }
 0x3db   :  { %536 = vsyncpa [#allocation6], 1 }

</bundles_post_ra>
